<compile_context>
chip_gen: v7x
topology: tpu7x:2x2x1
jax: 0.10.0
libtpu: 0.0.40
codegen_flags: <defaults>
</compile_context>

<pallas_src>
import functools
import math

import jax
import jax.numpy as jnp
from jax.experimental import pallas as pl
from jax.experimental.pallas import tpu as pltpu


def _round_up(n: int, m: int) -> int:
    return ((n + m - 1) // m) * m


# --------------------------------------------------------------------------
# Kernel: one grid step == one LSTM time step.
# --------------------------------------------------------------------------
def _lstm_seq_kernel(x_ref, h0_ref, c0_ref, wg_ref, bg_ref, wo_ref, bo_ref,
                     out_ref, hy_ref, cy_ref,
                     *, input_dim: int, hidden_dim: int):
    D, H = input_dim, hidden_dim
    t = pl.program_id(0)

    # Seed the recurrent state from the provided initial state on the first
    # grid step.  hy_ref / cy_ref have constant index_maps, so they stay
    # resident in VMEM across the whole sequence and double as the carry.
    @pl.when(t == 0)
    def _():
        hy_ref[...] = h0_ref[...]
        cy_ref[...] = c0_ref[...]

    x = x_ref[0]                 # (B, D)   streamed per step
    h = hy_ref[...]              # (B, H)   carried state
    c = cy_ref[...]              # (B, H)

    # Gate pre-activations: x @ W_ih.T + h @ W_hh.T + (b_ih + b_hh).
    # Single stacked resident weight (D+H, 4H); static sublane slices.
    gates = (jnp.dot(x, wg_ref[0:D, :], preferred_element_type=jnp.float32)
             + jnp.dot(h, wg_ref[D:D + H, :],
                       preferred_element_type=jnp.float32)
             + bg_ref[...])                                   # (B, 4H)

    # Full-vreg activations (EUP) + lane-mask select; gate order [i, f, g, o].
    lane = jax.lax.broadcasted_iota(jnp.int32, gates.shape, dimension=1)
    is_cell = jnp.logical_and(lane >= 2 * H, lane < 3 * H)
    act = jnp.where(is_cell, jnp.tanh(gates), jax.nn.sigmoid(gates))

    ingate = act[:, 0:H]
    forgetgate = act[:, H:2 * H]
    cellgate = act[:, 2 * H:3 * H]
    outgate = act[:, 3 * H:4 * H]

    cy = forgetgate * c + ingate * cellgate
    hy = outgate * jnp.tanh(cy)
    cy_ref[...] = cy
    hy_ref[...] = hy

    # Output projection into a lane-dense, 128-padded slab (wrapper slices
    # back to D).  W_oi.T / b_oi were zero-padded once at parameter-prep time.
    out_ref[0] = (jnp.dot(hy, wo_ref[...], preferred_element_type=jnp.float32)
                  + bo_ref[...])


# --------------------------------------------------------------------------
# One-time parameter packing (do NOT call per step).
# --------------------------------------------------------------------------
def prepare_lstm_params(W_ih, W_hh, b_ih, b_hh, W_oi, b_oi):
    four_h, D = W_ih.shape
    H = four_h // 4
    Np = _round_up(max(D, 1), 128)              # lane-dense output width

    w_gates = jnp.concatenate([W_ih.T, W_hh.T], axis=0)      # (D+H, 4H)
    b_gates = (b_ih + b_hh).reshape(1, 4 * H)                # (1, 4H)
    w_out = jnp.zeros((H, Np), jnp.float32).at[:, :D].set(W_oi.T)   # (H, Np)
    b_out = jnp.zeros((1, Np), jnp.float32).at[:, :D].set(b_oi)     # (1, Np)

    return {
        "w_gates": w_gates, "b_gates": b_gates,
        "w_out": w_out, "b_out": b_out,
        "input_dim": D, "hidden_dim": H, "padded_out_dim": Np,
    }


# --------------------------------------------------------------------------
# Fused-sequence wrapper: T applications of LSTM.forward in ONE pallas_call.
# --------------------------------------------------------------------------
def lstm_sequence_pallas(xs, hx, cx, packed):
    """xs: (T, B, D).  Returns (outputs (T, B, D), (hy, cy))."""
    T, B, D = xs.shape
    H = packed["hidden_dim"]
    Np = packed["padded_out_dim"]
    assert D == packed["input_dim"]
    assert hx.shape == (B, H) and cx.shape == (B, H)

    kernel = functools.partial(_lstm_seq_kernel, input_dim=D, hidden_dim=H)

    out_p, hy, cy = pl.pallas_call(
        kernel,
        grid=(T,),
        in_specs=[
            pl.BlockSpec((1, B, D), lambda t: (t, 0, 0)),      # x_t (streamed)
            pl.BlockSpec((B, H), lambda t: (0, 0)),            # h0 (resident)
            pl.BlockSpec((B, H), lambda t: (0, 0)),            # c0 (resident)
            pl.BlockSpec((D + H, 4 * H), lambda t: (0, 0)),    # stacked gate W
            pl.BlockSpec((1, 4 * H), lambda t: (0, 0)),        # fused gate bias
            pl.BlockSpec((H, Np), lambda t: (0, 0)),           # padded W_oi.T
            pl.BlockSpec((1, Np), lambda t: (0, 0)),           # padded b_oi
        ],
        out_specs=(
            pl.BlockSpec((1, B, Np), lambda t: (t, 0, 0)),     # per-step output
            pl.BlockSpec((B, H), lambda t: (0, 0)),            # hy carry/result
            pl.BlockSpec((B, H), lambda t: (0, 0)),            # cy carry/result
        ),
        out_shape=(
            jax.ShapeDtypeStruct((T, B, Np), jnp.float32),
            jax.ShapeDtypeStruct((B, H), jnp.float32),
            jax.ShapeDtypeStruct((B, H), jnp.float32),
        ),
        compiler_params=pltpu.CompilerParams(
            dimension_semantics=("arbitrary",)),   # time axis carries state
    )(xs, hx, cx, packed["w_gates"], packed["b_gates"],
      packed["w_out"], packed["b_out"])

    return out_p[:, :, :D], (hy, cy)


def lstm_forward_pallas(x, state, packed):
    """Matches LSTM.forward(x, state): one step -> (output, (hy, cy))."""
    hx, cx = state
    out_seq, new_state = lstm_sequence_pallas(x[None], hx, cx, packed)
    return out_seq[0], new_state


def initialize_state(key, batch_size, hidden_dim):
    kh, kc = jax.random.split(key)
    hx = jax.random.normal(kh, (batch_size, hidden_dim), jnp.float32)
    cx = jax.random.normal(kc, (batch_size, hidden_dim), jnp.float32)
    return hx, cx


def init_lstm_params(key, input_dim, hidden_dim):
    """Deterministic parameter init mirroring the PyTorch module's __init__."""
    k = math.sqrt(1.0 / hidden_dim)
    k_in = math.sqrt(1.0 / input_dim)
    keys = jax.random.split(key, 5)
    W_ih = jax.random.uniform(keys[0], (4 * hidden_dim, input_dim),
                              jnp.float32, -k, k)
    W_hh = jax.random.uniform(keys[1], (4 * hidden_dim, hidden_dim),
                              jnp.float32, -k, k)
    b_ih = jax.random.uniform(keys[2], (4 * hidden_dim,), jnp.float32, -k, k)
    b_hh = jax.random.uniform(keys[3], (4 * hidden_dim,), jnp.float32, -k, k)
    W_oi = jax.random.uniform(keys[4], (input_dim, hidden_dim),
                              jnp.float32, -k_in, k_in)
    b_oi = jnp.zeros((input_dim,), jnp.float32)
    return W_ih, W_hh, b_ih, b_hh, W_oi, b_oi


# --------------------------------------------------------------------------
# Pure-JAX reference of the module math.
# --------------------------------------------------------------------------
def _reference_step(x, hx, cx, W_ih, W_hh, b_ih, b_hh, W_oi, b_oi):
    gates = x @ W_ih.T + hx @ W_hh.T + b_ih + b_hh
    i, f, g, o = jnp.split(gates, 4, axis=-1)
    i = jax.nn.sigmoid(i)
    f = jax.nn.sigmoid(f)
    g = jnp.tanh(g)
    o = jax.nn.sigmoid(o)
    cy = f * cx + i * g
    hy = o * jnp.tanh(cy)
    out = hy @ W_oi.T + b_oi
    return out, (hy, cy)


def _reference_sequence(xs, hx, cx, *params):
    outs = []
    for t in range(xs.shape[0]):
        out, (hx, cx) = _reference_step(xs[t], hx, cx, *params)
        outs.append(out)
    return jnp.stack(outs), (hx, cx)


if __name__ == "__main__":
    input_dim, hidden_dim, batch, seq_len = 16, 32, 4, 8

    key = jax.random.PRNGKey(0)
    k_param, k_x, k_state = jax.random.split(key, 3)

    raw_params = init_lstm_params(k_param, input_dim, hidden_dim)
    packed = prepare_lstm_params(*raw_params)   # one-time weight packing

    xs = jax.random.normal(k_x, (seq_len, batch, input_dim), jnp.float32)
    hx, cx = initialize_state(k_state, batch, hidden_dim)

    # --- single step: exact equivalent of LSTM.forward(x, state) ---
    out1, (hy1, cy1) = lstm_forward_pallas(xs[0], (hx, cx), packed)
    jax.block_until_ready((out1, hy1, cy1))
    out1_r, (hy1_r, cy1_r) = _reference_step(xs[0], hx, cx, *raw_params)
    assert jnp.allclose(out1, out1_r, atol=1e-4, rtol=1e-4)
    assert jnp.allclose(hy1, hy1_r, atol=1e-4, rtol=1e-4)
    assert jnp.allclose(cy1, cy1_r, atol=1e-4, rtol=1e-4)

    # --- fused sequence: T repeated forward steps in ONE pallas_call ---
    outs, (hy, cy) = lstm_sequence_pallas(xs, hx, cx, packed)
    jax.block_until_ready((outs, hy, cy))
    outs_r, (hy_r, cy_r) = _reference_sequence(xs, hx, cx, *raw_params)
    assert jnp.allclose(outs, outs_r, atol=1e-4, rtol=1e-4)
    assert jnp.allclose(hy, hy_r, atol=1e-4, rtol=1e-4)
    assert jnp.allclose(cy, cy_r, atol=1e-4, rtol=1e-4)

    # TODO(synk): jacobian_cell_step / step_jacobian (torch.func autodiff
    # utilities) are not part of the forward pass and are not translated.
    print("KERNEL_OK")
</pallas_src>

<mosaic_0001>
module attributes {stable_mosaic.version = 11 : i64} {
  func.func @_lstm_seq_kernel(%arg0: i32, %arg1: memref<1x4x16xf32, #tpu.memory_space<vmem>>, %arg2: memref<4x32xf32, #tpu.memory_space<vmem>>, %arg3: memref<4x32xf32, #tpu.memory_space<vmem>>, %arg4: memref<48x128xf32, #tpu.memory_space<vmem>>, %arg5: memref<1x128xf32, #tpu.memory_space<vmem>>, %arg6: memref<32x128xf32, #tpu.memory_space<vmem>>, %arg7: memref<1x128xf32, #tpu.memory_space<vmem>>, %arg8: memref<1x4x128xf32, #tpu.memory_space<vmem>>, %arg9: memref<4x32xf32, #tpu.memory_space<vmem>>, %arg10: memref<4x32xf32, #tpu.memory_space<vmem>>) attributes {dimension_semantics = [#tpu.dimension_semantics<arbitrary>], iteration_bounds = array<i64: 1>, scalar_prefetch = 0 : i64, scratch_operands = 0 : i64, tpu.core_type = #tpu.core_type<tc>, window_params = [{transform_indices = @transform_0, window_bounds = array<i64: 1, 4, 16>}, {pipeline_mode = #tpu.pipeline_mode<synchronous>, transform_indices = @transform_1, window_bounds = array<i64: 4, 32>}, {pipeline_mode = #tpu.pipeline_mode<synchronous>, transform_indices = @transform_2, window_bounds = array<i64: 4, 32>}, {pipeline_mode = #tpu.pipeline_mode<synchronous>, transform_indices = @transform_3, window_bounds = array<i64: 48, 128>}, {pipeline_mode = #tpu.pipeline_mode<synchronous>, transform_indices = @transform_4, window_bounds = array<i64: 1, 128>}, {pipeline_mode = #tpu.pipeline_mode<synchronous>, transform_indices = @transform_5, window_bounds = array<i64: 32, 128>}, {pipeline_mode = #tpu.pipeline_mode<synchronous>, transform_indices = @transform_6, window_bounds = array<i64: 1, 128>}, {transform_indices = @transform_7, window_bounds = array<i64: 1, 4, 128>}, {pipeline_mode = #tpu.pipeline_mode<synchronous>, transform_indices = @transform_8, window_bounds = array<i64: 4, 32>}, {pipeline_mode = #tpu.pipeline_mode<synchronous>, transform_indices = @transform_9, window_bounds = array<i64: 4, 32>}]} {
    %c0_i32 = arith.constant 0 : i32
    %0 = arith.cmpi eq, %arg0, %c0_i32 : i32
    %1 = arith.extui %0 : i1 to i32
    %c0_i32_0 = arith.constant 0 : i32
    %2 = arith.cmpi ne, %1, %c0_i32_0 : i32
    scf.if %2 {
      %c0_26 = arith.constant 0 : index
      %c0_27 = arith.constant 0 : index
      %47 = vector.load %arg2[%c0_26, %c0_27] : memref<4x32xf32, #tpu.memory_space<vmem>>, vector<4x32xf32>
      %c0_28 = arith.constant 0 : index
      %c0_29 = arith.constant 0 : index
      %48 = vector.load %arg9[%c0_28, %c0_29] : memref<4x32xf32, #tpu.memory_space<vmem>>, vector<4x32xf32>
      tpu.vector_store %arg9[%c0_28, %c0_29], %47 {strides = array<i32>} : memref<4x32xf32, #tpu.memory_space<vmem>>, vector<4x32xf32>,
      %c0_30 = arith.constant 0 : index
      %c0_31 = arith.constant 0 : index
      %49 = vector.load %arg3[%c0_30, %c0_31] : memref<4x32xf32, #tpu.memory_space<vmem>>, vector<4x32xf32>
      %c0_32 = arith.constant 0 : index
      %c0_33 = arith.constant 0 : index
      %50 = vector.load %arg10[%c0_32, %c0_33] : memref<4x32xf32, #tpu.memory_space<vmem>>, vector<4x32xf32>
      tpu.vector_store %arg10[%c0_32, %c0_33], %49 {strides = array<i32>} : memref<4x32xf32, #tpu.memory_space<vmem>>, vector<4x32xf32>,
    } else {
    }
    %c0 = arith.constant 0 : index
    %c0_1 = arith.constant 0 : index
    %c0_2 = arith.constant 0 : index
    %3 = vector.load %arg1[%c0, %c0_1, %c0_2] : memref<1x4x16xf32, #tpu.memory_space<vmem>>, vector<1x4x16xf32>
    %4 = vector.shape_cast %3 : vector<1x4x16xf32> to vector<4x16xf32>
    %c0_3 = arith.constant 0 : index
    %c0_4 = arith.constant 0 : index
    %5 = vector.load %arg9[%c0_3, %c0_4] : memref<4x32xf32, #tpu.memory_space<vmem>>, vector<4x32xf32>
    %c0_5 = arith.constant 0 : index
    %c0_6 = arith.constant 0 : index
    %6 = vector.load %arg10[%c0_5, %c0_6] : memref<4x32xf32, #tpu.memory_space<vmem>>, vector<4x32xf32>
    %c0_7 = arith.constant 0 : index
    %c0_8 = arith.constant 0 : index
    %7 = vector.load %arg4[%c0_7, %c0_8] : memref<48x128xf32, #tpu.memory_space<vmem>>, vector<16x128xf32>
    %cst = arith.constant dense<0.000000e+00> : vector<4x128xf32>
    %8 = tpu.matmul %4, %7, %cst {dimension_numbers = #tpu.dot_dimension_numbers<[1], [0], [0], [1], [0, 0, 1, 1], [], []>} : vector<4x16xf32>, vector<16x128xf32>, vector<4x128xf32> -> vector<4x128xf32>
    %c16 = arith.constant 16 : index
    %c0_9 = arith.constant 0 : index
    %9 = vector.load %arg4[%c16, %c0_9] : memref<48x128xf32, #tpu.memory_space<vmem>>, vector<32x128xf32>
    %cst_10 = arith.constant dense<0.000000e+00> : vector<4x128xf32>
    %10 = tpu.matmul %5, %9, %cst_10 {dimension_numbers = #tpu.dot_dimension_numbers<[1], [0], [0], [1], [0, 0, 1, 1], [], []>} : vector<4x32xf32>, vector<32x128xf32>, vector<4x128xf32> -> vector<4x128xf32>
    %11 = arith.addf %8, %10 : vector<4x128xf32>
    %c0_11 = arith.constant 0 : index
    %c0_12 = arith.constant 0 : index
    %12 = vector.load %arg5[%c0_11, %c0_12] : memref<1x128xf32, #tpu.memory_space<vmem>>, vector<1x128xf32>
    %13 = vector.broadcast %12 : vector<1x128xf32> to vector<4x128xf32>
    %14 = arith.addf %11, %13 : vector<4x128xf32>
    %15 = tpu.iota {dimensions = array<i32: 1>} : vector<4x128xi32>
    %c64_i32 = arith.constant 64 : i32
    %16 = vector.broadcast %c64_i32 : i32 to vector<4x128xi32>
    %17 = arith.cmpi sge, %15, %16 : vector<4x128xi32>
    %c96_i32 = arith.constant 96 : i32
    %18 = vector.broadcast %c96_i32 : i32 to vector<4x128xi32>
    %19 = arith.cmpi slt, %15, %18 : vector<4x128xi32>
    %20 = arith.andi %17, %19 : vector<4x128xi1>
    %21 = math.tanh %14 : vector<4x128xf32>
    %22 = arith.negf %14 : vector<4x128xf32>
    %23 = math.exp %22 : vector<4x128xf32>
    %cst_13 = arith.constant 1.000000e+00 : f32
    %24 = vector.broadcast %cst_13 : f32 to vector<4x128xf32>
    %25 = arith.addf %24, %23 : vector<4x128xf32>
    %26 = arith.divf %24, %25 : vector<4x128xf32>
    %27 = arith.select %20, %21, %26 : vector<4x128xi1>, vector<4x128xf32>
    %28 = vector.extract_strided_slice %27 {offsets = [0, 0], sizes = [4, 32], strides = [1, 1]} : vector<4x128xf32> to vector<4x32xf32>
    %29 = vector.extract_strided_slice %27 {offsets = [0, 32], sizes = [4, 32], strides = [1, 1]} : vector<4x128xf32> to vector<4x32xf32>
    %30 = vector.extract_strided_slice %27 {offsets = [0, 64], sizes = [4, 32], strides = [1, 1]} : vector<4x128xf32> to vector<4x32xf32>
    %31 = vector.extract_strided_slice %27 {offsets = [0, 96], sizes = [4, 32], strides = [1, 1]} : vector<4x128xf32> to vector<4x32xf32>
    %32 = arith.mulf %29, %6 : vector<4x32xf32>
    %33 = arith.mulf %28, %30 : vector<4x32xf32>
    %34 = arith.addf %32, %33 : vector<4x32xf32>
    %35 = math.tanh %34 : vector<4x32xf32>
    %36 = arith.mulf %31, %35 : vector<4x32xf32>
    %c0_14 = arith.constant 0 : index
    %c0_15 = arith.constant 0 : index
    %37 = vector.load %arg10[%c0_14, %c0_15] : memref<4x32xf32, #tpu.memory_space<vmem>>, vector<4x32xf32>
    tpu.vector_store %arg10[%c0_14, %c0_15], %34 {strides = array<i32>} : memref<4x32xf32, #tpu.memory_space<vmem>>, vector<4x32xf32>,
    %c0_16 = arith.constant 0 : index
    %c0_17 = arith.constant 0 : index
    %38 = vector.load %arg9[%c0_16, %c0_17] : memref<4x32xf32, #tpu.memory_space<vmem>>, vector<4x32xf32>
    tpu.vector_store %arg9[%c0_16, %c0_17], %36 {strides = array<i32>} : memref<4x32xf32, #tpu.memory_space<vmem>>, vector<4x32xf32>,
    %c0_18 = arith.constant 0 : index
    %c0_19 = arith.constant 0 : index
    %39 = vector.load %arg6[%c0_18, %c0_19] : memref<32x128xf32, #tpu.memory_space<vmem>>, vector<32x128xf32>
    %cst_20 = arith.constant dense<0.000000e+00> : vector<4x128xf32>
    %40 = tpu.matmul %36, %39, %cst_20 {dimension_numbers = #tpu.dot_dimension_numbers<[1], [0], [0], [1], [0, 0, 1, 1], [], []>} : vector<4x32xf32>, vector<32x128xf32>, vector<4x128xf32> -> vector<4x128xf32>
    %c0_21 = arith.constant 0 : index
    %c0_22 = arith.constant 0 : index
    %41 = vector.load %arg7[%c0_21, %c0_22] : memref<1x128xf32, #tpu.memory_space<vmem>>, vector<1x128xf32>
    %42 = vector.broadcast %41 : vector<1x128xf32> to vector<4x128xf32>
    %43 = arith.addf %40, %42 : vector<4x128xf32>
    %c0_23 = arith.constant 0 : index
    %c0_24 = arith.constant 0 : index
    %c0_25 = arith.constant 0 : index
    %44 = vector.load %arg8[%c0_23, %c0_24, %c0_25] : memref<1x4x128xf32, #tpu.memory_space<vmem>>, vector<1x4x128xf32>
    %45 = vector.shape_cast %44 : vector<1x4x128xf32> to vector<4x128xf32>
    %46 = vector.shape_cast %43 : vector<4x128xf32> to vector<1x4x128xf32>
    tpu.vector_store %arg8[%c0_23, %c0_24, %c0_25], %46 {strides = array<i32>} : memref<1x4x128xf32, #tpu.memory_space<vmem>>, vector<1x4x128xf32>,
    return
  }
  func.func @transform_0(%arg0: i32) -> (i32, i32, i32) {
    %c0_i32 = arith.constant 0 : i32
    %c0_i32_0 = arith.constant 0 : i32
    %c0_i32_1 = arith.constant 0 : i32
    return %arg0, %c0_i32, %c0_i32_0 : i32, i32, i32
  }
  func.func @transform_1(%arg0: i32) -> (i32, i32) {
    %c0_i32 = arith.constant 0 : i32
    %c0_i32_0 = arith.constant 0 : i32
    %c0_i32_1 = arith.constant 0 : i32
    return %c0_i32, %c0_i32_0 : i32, i32
  }
  func.func @transform_2(%arg0: i32) -> (i32, i32) {
    %c0_i32 = arith.constant 0 : i32
    %c0_i32_0 = arith.constant 0 : i32
    %c0_i32_1 = arith.constant 0 : i32
    return %c0_i32, %c0_i32_0 : i32, i32
  }
  func.func @transform_3(%arg0: i32) -> (i32, i32) {
    %c0_i32 = arith.constant 0 : i32
    %c0_i32_0 = arith.constant 0 : i32
    %c0_i32_1 = arith.constant 0 : i32
    return %c0_i32, %c0_i32_0 : i32, i32
  }
  func.func @transform_4(%arg0: i32) -> (i32, i32) {
    %c0_i32 = arith.constant 0 : i32
    %c0_i32_0 = arith.constant 0 : i32
    %c0_i32_1 = arith.constant 0 : i32
    return %c0_i32, %c0_i32_0 : i32, i32
  }
  func.func @transform_5(%arg0: i32) -> (i32, i32) {
    %c0_i32 = arith.constant 0 : i32
    %c0_i32_0 = arith.constant 0 : i32
    %c0_i32_1 = arith.constant 0 : i32
    return %c0_i32, %c0_i32_0 : i32, i32
  }
  func.func @transform_6(%arg0: i32) -> (i32, i32) {
    %c0_i32 = arith.constant 0 : i32
    %c0_i32_0 = arith.constant 0 : i32
    %c0_i32_1 = arith.constant 0 : i32
    return %c0_i32, %c0_i32_0 : i32, i32
  }
  func.func @transform_7(%arg0: i32) -> (i32, i32, i32) {
    %c0_i32 = arith.constant 0 : i32
    %c0_i32_0 = arith.constant 0 : i32
    %c0_i32_1 = arith.constant 0 : i32
    return %arg0, %c0_i32, %c0_i32_0 : i32, i32, i32
  }
  func.func @transform_8(%arg0: i32) -> (i32, i32) {
    %c0_i32 = arith.constant 0 : i32
    %c0_i32_0 = arith.constant 0 : i32
    %c0_i32_1 = arith.constant 0 : i32
    return %c0_i32, %c0_i32_0 : i32, i32
  }
  func.func @transform_9(%arg0: i32) -> (i32, i32) {
    %c0_i32 = arith.constant 0 : i32
    %c0_i32_0 = arith.constant 0 : i32
    %c0_i32_1 = arith.constant 0 : i32
    return %c0_i32, %c0_i32_0 : i32, i32
  }
}

</mosaic_0001>

<bundles_post_ra>
// kernel: tpu_custom_call.1
= control target key start
LH: loop header
LB: loop body
LE: loop exit
PB: predicated region body
PF: predicated region fallthrough
CT: control target
= control target key end

     0   :  { %15 = vsyncpa [#allocation3], 0  ;;  %s851_s0 = inlined_call_operand.hbm [shape: f32[1,4,16], index: 0, kind: input, shape index: {}]   ;;  %s852_s1 = inlined_call_operand.hbm [shape: f32[4,32], index: 1, kind: input, shape index: {}]   ;;  %s853_s2 = inlined_call_operand.vmem [shape: f32[4,32], index: 2, kind: input, shape index: {}]   ;;  %s854_s3 = inlined_call_operand.hbm [shape: f32[48,128], index: 3, kind: input, shape index: {}]   ;;  %s855_s4 = inlined_call_operand.vmem [shape: f32[1,128], index: 4, kind: input, shape index: {}]   ;;  %s856_s5 = inlined_call_operand.hbm [shape: f32[32,128], index: 5, kind: input, shape index: {}]   ;;  %s857_s6 = inlined_call_operand.vmem [shape: f32[1,128], index: 6, kind: input, shape index: {}]   ;;  %s858_s7 = inlined_call_operand.hbm [shape: f32[1,4,128], index: 7, kind: output, shape index: {0}]   ;;  %s859_s8 = inlined_call_operand.hbm [shape: f32[4,32], index: 8, kind: output, shape index: {1}]   ;;  %s860_s9 = inlined_call_operand.hbm [shape: f32[4,32], index: 9, kind: output, shape index: {2}]  }
   0x1   :  { %16 = vsyncpa [#allocation6], 0 }
   0x2   :  { %17 = vsyncpa [#allocation9], 0 }
   0x3   :  { %18 = vsyncpa [#allocation4], 0 }
   0x4   :  { %19 = vsyncpa [#allocation12], 0  ;;  %s679_s30 = smov [#allocation5]   ;;  %s680_s11 = smov [#allocation2]  }
   0x5   :  { %s36_s10 = sshll.u32 %s679_s30, 4  ;;  %s26_s12 = sshll.u32 %s680_s11, 4  ;;  %s37_s10 = int_to_ptr.vmem [resolvable:$true] %s36_s10  ;;  %s27_s12 = int_to_ptr.vmem [resolvable:$true] %s26_s12 }
   0x6   :  { %s515_s15 = scalar_lea.hbm %s852_s1, 64 }
   0x7   :  { %p516_p0 = scmp.ne.s32.totalorder %s852_s1, %s515_s15  ;;  %p519_p1 = scmp.lt.u32.totalorder %s515_s15, %s852_s1 }
   0x9   :  { %p521_p2 = pnand %p519_p1, %p516_p0 }
   0xb   :  { %524 = shalt.err (!%p521_p2)
}
   0xc   :  { %s525_s20 = scalar_lea.vmem %s37_s10, 64  ;;  %p530_p4 = scmp.lt.s32.totalorder %s37_s10, %s37_s10 }
   0xd   :  { %p526_p3 = scmp.ne.s32.totalorder %s37_s10, %s525_s20  ;;  %p531_p5 = scmp.lt.s32.totalorder %s525_s20, %s525_s20 }
   0xf   :  { %p532_p6 = por %p531_p5, %p530_p4 }
  0x11   :  { %p533_p7 = pnand %p532_p6, %p526_p3 }
  0x13   :  { %536 = shalt.err (!%p533_p7)
}
  0x14   :  { %39 = dma.hbm_to_vmem [thread:$0]  %s852_s1, 64, %s37_s10, [#allocation6]  }
  0x15   :  { %s537_s25 = scalar_lea.hbm %s851_s0, 64 }
  0x16   :  { %p538_p8 = scmp.ne.s32.totalorder %s851_s0, %s537_s25  ;;  %p541_p9 = scmp.lt.u32.totalorder %s537_s25, %s851_s0 }
  0x18   :  { %p543_p10 = pnand %p541_p9, %p538_p8 }
  0x1a   :  { %546 = shalt.err (!%p543_p10)
}
  0x1b   :  { %s547_s30 = scalar_lea.vmem %s27_s12, 64  ;;  %p552_p12 = scmp.lt.s32.totalorder %s27_s12, %s27_s12 }
  0x1c   :  { %p548_p11 = scmp.ne.s32.totalorder %s27_s12, %s547_s30  ;;  %p553_p13 = scmp.lt.s32.totalorder %s547_s30, %s547_s30 }
  0x1e   :  { %p554_p0 = por %p553_p13, %p552_p12 }
  0x20   :  { %p555_p1 = pnand %p554_p0, %p548_p11 }
  0x22   :  { %558 = shalt.err (!%p555_p1)
}
  0x23   :  { %29 = dma.hbm_to_vmem [thread:$0]  %s851_s0, 64, %s27_s12, [#allocation3]  }
  0x24   :  { %s681_s11 = smov [#allocation7]   ;;  %s559_s16 = scalar_lea.hbm %s854_s3, 768 }
  0x25   :  { %s47_s13 = sshll.u32 %s681_s11, 4  ;;  %p560_p2 = scmp.ne.s32.totalorder %s854_s3, %s559_s16  ;;  %s48_s13 = int_to_ptr.vmem [resolvable:$true] %s47_s13 }
  0x26   :  { %p563_p3 = scmp.lt.u32.totalorder %s559_s16, %s854_s3 }
  0x28   :  { %p565_p4 = pnand %p563_p3, %p560_p2 }
  0x2a   :  { %568 = shalt.err (!%p565_p4)
}
  0x2b   :  { %s569_s21 = scalar_lea.vmem %s48_s13, 768  ;;  %p574_p6 = scmp.lt.s32.totalorder %s48_s13, %s48_s13 }
  0x2c   :  { %p570_p5 = scmp.ne.s32.totalorder %s48_s13, %s569_s21  ;;  %p575_p7 = scmp.lt.s32.totalorder %s569_s21, %s569_s21 }
  0x2e   :  { %p576_p8 = por %p575_p7, %p574_p6 }
  0x30   :  { %p577_p9 = pnand %p576_p8, %p570_p5 }
  0x32   :  { %580 = shalt.err (!%p577_p9)
}
  0x33   :  { %s682_s0 = smov 128   ;;  %s683_s12 = smov 8  }
  0x34   :  { %53 = dma.hbm_to_vmem [thread:$0]  %s854_s3, 768, %s48_s13, [#allocation6], %s682_s0, %s682_s0, %s683_s12  }
  0x35   :  { %s684_s24 = smov [#allocation8]   ;;  %s581_s28 = scalar_lea.hbm %s856_s5, 512 }
  0x36   :  { %s61_s25 = sshll.u32 %s684_s24, 4  ;;  %p582_p10 = scmp.ne.s32.totalorder %s856_s5, %s581_s28  ;;  %s62_s25 = int_to_ptr.vmem [resolvable:$true] %s61_s25 }
  0x37   :  { %p585_p11 = scmp.lt.u32.totalorder %s581_s28, %s856_s5 }
  0x39   :  { %p587_p12 = pnand %p585_p11, %p582_p10 }
  0x3b   :  { %590 = shalt.err (!%p587_p12)
}
  0x3c   :  { %s591_s11 = scalar_lea.vmem %s62_s25, 512  ;;  %p596_p0 = scmp.lt.s32.totalorder %s62_s25, %s62_s25 }
  0x3d   :  { %p592_p13 = scmp.ne.s32.totalorder %s62_s25, %s591_s11  ;;  %p597_p1 = scmp.lt.s32.totalorder %s591_s11, %s591_s11 }
  0x3f   :  { %p598_p2 = por %p597_p1, %p596_p0 }
  0x41   :  { %p599_p3 = pnand %p598_p2, %p592_p13 }
  0x43   :  { %602 = shalt.err (!%p599_p3)
}
  0x44   :  { %67 = dma.hbm_to_vmem [thread:$0]  %s856_s5, 512, %s62_s25, [#allocation9], %s682_s0, %s682_s0, %s683_s12  }
  0x45   :  { %669 = dma.done.wait [#allocation3], 64  }
  0x46   :  { %670 = vsyncadd [#allocation3], 4294967232 }
  0x47   :  { %671 = dma.done.wait [#allocation6], 832  }
  0x48   :  { %672 = vsyncadd [#allocation6], 4294966464 }
  0x49   :  { %673 = dma.done.wait [#allocation9], 512  }
  0x4a   :  { %674 = vsyncadd [#allocation9], 4294966784  ;;  %v685_v0 = vmov 0.0|0.0   ;;  %vm686_vm0 = vmmov 0   ;;  %v687_v1 = vmov 0.0   ;;  %v96_v2 = vld [vmem:[#allocation7 + $0x10] sm:$0xff]  ;;  %v256_v24 = vlaneseq }
  0x4b   :  { %477 = vmatprep.subr.bf16.mxu0 %v685_v0  ;;  %483 = vmatprep.subr.bf16.mxu1 %v685_v0  ;;  %v97_v3 = vld [vmem:[#allocation7 + $0x18] sm:$0xff]  ;;  %v94_v4 = vld [vmem:[#allocation7] sm:$0xff]  ;;  %vm87_vm1 = vcmask 257024   ;;  %v95_v6 = vld [vmem:[#allocation7 + $0x8] sm:$0xff]  ;;  %vm174_vm2 = vcmask 130048   ;;  %vm100_vm3 = vcmask 261120  }
  0x4c   :  { %463 = vmatprep.mubr.msk.f32.mxu1 %vm686_vm0, %v687_v1  ;;  %456 = vmatprep.mubr.msk.f32.mxu0 %vm686_vm0, %v687_v1  ;;  %v478_v5 = vpack.c.bf16 %v97_v3, %v96_v2  ;;  %v98_v7 = vld [vmem:[#allocation7 + $0x20] sm:$0xff]  ;;  %v99_v8 = vld [vmem:[#allocation7 + $0x28] sm:$0xff]  ;;  %v484_v9 = vpack.c.bf16 %v95_v6, %v94_v4  ;;  %v86_v10 = vld [vmem:[#allocation5] sm:$0xf]  ;;  %v257_v26 = vand.u32 127, %v256_v24  ;;  %s690_s17 = smov 96  }
  0x4d   :  { %v481_v11 = vpack.c.bf16 %v99_v8, %v98_v7  ;;  %88 = vst.msk [vmem:[#allocation11] sm:$0xf] %vm87_vm1, %v86_v10  ;;  %v91_v12 = vld [vmem:[#allocation2] sm:$0xf]  ;;  %v301_v37 = vld [vmem:[#allocation8] sm:$0xff]  ;;  %v303_v39 = vld [vmem:[#allocation8 + $0x10] sm:$0xff] }
  0x4e   :  { %479 = vmatpush3.bf16.msra.mxu0 %v478_v5  ;;  %485 = vmatpush3.bf16.msra.mxu1 %v484_v9  ;;  %v89_v14 = vld [vmem:[%s853_s2] sm:$0xf]  ;;  %vm258_vm4 = vcmp.ge.s32.totalorder %v257_v26, 64  ;;  %vm259_vm5 = vcmp.lt.s32.totalorder %v257_v26, 96  ;;  %s688_s2 = smov 64   ;;  %v304_v41 = vld [vmem:[#allocation8 + $0x18] sm:$0xff] }
  0x4f   :  { %480 = vmatprep.subr.bf16.mxu0 %v685_v0  ;;  %486 = vmatprep.subr.bf16.mxu1 %v685_v0  ;;  %90 = vst.msk [vmem:[#allocation13] sm:$0xf] %vm87_vm1, %v89_v14  ;;  %v431_v18 = vld [vmem:[%s855_s4] ss:$0 sm:$0xff]  ;;  %vm260_vm6 = vmand %vm258_vm4, %vm259_vm5  ;;  %s689_s4 = smov 32   ;;  %v490_v42 = vpack.c.bf16 %v304_v41, %v303_v39  ;;  %s691_s18 = smov [#allocation11]  }
  0x50   :  { %v302_v38 = vld [vmem:[#allocation8 + $0x8] sm:$0xff]  ;;  %s401_s19 = sshll.u32 %s691_s18, 4  ;;  %s402_s19 = int_to_ptr.vmem [resolvable:$true] %s401_s19 }
  0x51   :  { %464 = vmatmul.mubr.msk.f32.vlgmr.msra.gmra.mrb[0].mxu1 %vm174_vm2, %v91_v12  ;;  %v487_v40 = vpack.c.bf16 %v302_v38, %v301_v37  ;;  %s603_s20 = scalar_lea.vmem %s402_s19, 64  ;;  %p608_p5 = scmp.lt.s32.totalorder %s402_s19, %s402_s19 }
  0x52   :  { %482 = vmatpush3.bf16.msra.mxu0 %v481_v11  ;;  %474 = vmatprep.mubr.msk.f32.mxu1 %vm686_vm0, %v687_v1  ;;  %p604_p4 = scmp.ne.s32.totalorder %s402_s19, %s603_s20  ;;  %p609_p6 = scmp.lt.s32.totalorder %s603_s20, %s603_s20 }
  0x53   :  { %488 = vmatpush3.bf16.msra.mxu1 %v487_v40 }
  0x54   :  { %v92_v13 = vld [vmem:[#allocation11] sm:$0xf]  ;;  %489 = vmatprep.subr.bf16.mxu1 %v685_v0  ;;  %p610_p7 = por %p609_p6, %p608_p5 }
  0x55   :  { %457 = vmatmul.mubr.msk.f32.vlgmr.msra.gmra.mrb[0].mxu0 %vm100_vm3, %v92_v13 }
  0x56   :  { %v93_v30 = vld [vmem:[#allocation13] sm:$0xf]  ;;  %p611_p8 = pnand %p610_p7, %p604_p4 }
  0x57   :  { %491 = vmatpush3.bf16.msra.mxu1 %v490_v42 }
 0x124   :  { %v244_v15 = vpop.f32.mrb[0].mxu1 }
 0x125   :  { %v465_v16 = vpop.f32.mrb[1].mxu1 }
 0x128   :  { %v170_v17 = vpop.f32.mrb[0].mxu0 }
 0x129   :  { %v245_v19 = vadd.f32 %v244_v15, %v170_v17  ;;  %v458_v20 = vpop.f32.mrb[1].mxu0 }
 0x12b   :  { %v255_v21 = vadd.f32 %v431_v18, %v245_v19 }
 0x12d   :  { %v432_v22 = vmul.f32 -1.442695, %v255_v21 }
 0x12f   :  { %507 = vpow2.f32 %v432_v22 }
 0x130   :  { %509 = vtanh.f32 %v255_v21 }
 0x139   :  { %v508_v23 = vpop.eup %507 }
 0x13a   :  { %v265_v25 = vadd.f32 1.0, %v508_v23  ;;  %v510_v27 = vpop.eup %509 }
 0x13c   :  { %511 = vrcp.f32 %v265_v25 }
 0x146   :  { %v512_v28 = vpop.eup %511 }
 0x147   :  { %v268_v29 = vsel %vm260_vm6, %v510_v27, %v512_v28 }
 0x148   :  { %275 = vrot.lane.b32.xlu0 %v268_v29, %s688_s2 }
 0x14c   :  { %270 = vrot.lane.b32.xlu0 %v93_v30, %s689_s4 }
 0x1ba   :  { %v276_v31 = vpop.permute.xlu0 %275 }
 0x1bb   :  { %v278_v32 = vmul.f32 %v276_v31, %v268_v29 }
 0x1bd   :  { %280 = vrot.lane.b32.xlu1 %v278_v32, %s689_s4 }
 0x1be   :  { %v271_v33 = vpop.permute.xlu0 %270 }
 0x1bf   :  { %v273_v34 = vmul.f32 %v271_v33, %v268_v29 }
 0x22f   :  { %v281_v35 = vpop.permute.xlu1 %280 }
 0x230   :  { %v283_v36 = vadd.f32 %v281_v35, %v273_v34 }
 0x232   :  { %513 = vtanh.f32 %v283_v36 }
 0x23c   :  { %v514_v43 = vpop.eup %513 }
 0x23d   :  { %286 = vrot.lane.b32.xlu1 %v514_v43, %s688_s2 }
 0x241   :  { %291 = vrot.lane.b32.xlu1 %v283_v36, %s690_s17 }
 0x2af   :  { %v287_v44 = vpop.permute.xlu1 %286 }
 0x2b0   :  { %v289_v45 = vmul.f32 %v287_v44, %v268_v29 }
 0x2b2   :  { %297 = vrot.lane.b32.xlu0 %v289_v45, %s689_s4 }
 0x2b3   :  { %v292_v46 = vpop.permute.xlu1 %291 }
 0x2b4   :  { %295 = vst.msk [vmem:[#allocation13] sm:$0xf] %vm87_vm1, %v292_v46 }
 0x324   :  { %v298_v47 = vpop.permute.xlu0 %297 }
 0x325   :  { %300 = vst.msk [vmem:[#allocation11] sm:$0xf] %vm87_vm1, %v298_v47  ;;  %475 = vmatmul.mubr.msk.f32.vlgmr.msra.gmra.mrb[2].mxu1 %vm100_vm3, %v298_v47 }
 0x326   :  { %614 = shalt.err (!%p611_p8)
}
 0x327   :  { %s615_s12 = scalar_lea.hbm %s859_s8, 64 }
 0x328   :  { %p616_p9 = scmp.ne.s32.totalorder %s859_s8, %s615_s12  ;;  %p619_p10 = scmp.lt.u32.totalorder %s615_s12, %s859_s8 }
 0x32a   :  { %p621_p11 = pnand %p619_p10, %p616_p9 }
 0x32c   :  { %624 = shalt.err (!%p621_p11)
}
 0x32d   :  { %404 = dma.vmem_to_hbm [thread:$0]  %s402_s19, 64, %s859_s8, [#allocation12]  }
 0x32e   :  { %s692_s28 = smov [#allocation13]  }
 0x32f   :  { %s411_s29 = sshll.u32 %s692_s28, 4  ;;  %s412_s29 = int_to_ptr.vmem [resolvable:$true] %s411_s29 }
 0x330   :  { %s625_s30 = scalar_lea.vmem %s412_s29, 64  ;;  %p630_p13 = scmp.lt.s32.totalorder %s412_s29, %s412_s29 }
 0x331   :  { %p626_p12 = scmp.ne.s32.totalorder %s412_s29, %s625_s30  ;;  %p631_p0 = scmp.lt.s32.totalorder %s625_s30, %s625_s30 }
 0x333   :  { %p632_p1 = por %p631_p0, %p630_p13 }
 0x335   :  { %p633_p2 = pnand %p632_p1, %p626_p12 }
 0x337   :  { %636 = shalt.err (!%p633_p2)
}
 0x338   :  { %s637_s11 = scalar_lea.hbm %s860_s9, 64 }
 0x339   :  { %p638_p3 = scmp.ne.s32.totalorder %s860_s9, %s637_s11  ;;  %p641_p4 = scmp.lt.u32.totalorder %s637_s11, %s860_s9 }
 0x33b   :  { %p643_p5 = pnand %p641_p4, %p638_p3 }
 0x33d   :  { %646 = shalt.err (!%p643_p5)
}
 0x33e   :  { %414 = dma.vmem_to_hbm [thread:$0]  %s412_s29, 64, %s860_s9, [#allocation12]   ;;  %v433_v48 = vld [vmem:[%s857_s6] ss:$0 sm:$0xff] }
 0x33f   :  { %s693_s4 = smov [#allocation10]  }
 0x340   :  { %s391_s17 = sshll.u32 %s693_s4, 4  ;;  %s392_s17 = int_to_ptr.vmem [resolvable:$true] %s391_s17 }
 0x341   :  { %s647_s18 = scalar_lea.vmem %s392_s17, 64  ;;  %p652_p7 = scmp.lt.s32.totalorder %s392_s17, %s392_s17 }
 0x342   :  { %p648_p6 = scmp.ne.s32.totalorder %s392_s17, %s647_s18  ;;  %p653_p8 = scmp.lt.s32.totalorder %s647_s18, %s647_s18 }
 0x344   :  { %p654_p9 = por %p653_p8, %p652_p7 }
 0x346   :  { %p655_p10 = pnand %p654_p9, %p648_p6 }
 0x3f8   :  { %v380_v49 = vpop.f32.mrb[2].mxu1 }
 0x3f9   :  { %v381_v50 = vadd.f32 %v433_v48, %v380_v49  ;;  %v476_v51 = vpop.f32.mrb[3].mxu1 }
 0x3fb   :  { %384 = vst [vmem:[#allocation10] sm:$0xf] %v381_v50 }
 0x3fc   :  { %658 = shalt.err (!%p655_p10)
}
 0x3fd   :  { %s659_s20 = scalar_lea.hbm %s858_s7, 64 }
 0x3fe   :  { %p660_p11 = scmp.ne.s32.totalorder %s858_s7, %s659_s20  ;;  %p663_p12 = scmp.lt.u32.totalorder %s659_s20, %s858_s7 }
 0x400   :  { %p665_p13 = pnand %p663_p12, %p660_p11 }
 0x402   :  { %668 = shalt.err (!%p665_p13)
}
 0x403   :  { %394 = dma.vmem_to_hbm [thread:$0]  %s392_s17, 64, %s858_s7, [#allocation4]  }
 0x404   :  { %675 = dma.done.wait [#allocation4], 64  }
 0x405   :  { %676 = vsyncadd [#allocation4], 4294967232 }
 0x406   :  { %677 = dma.done.wait [#allocation12], 128  }
 0x407   :  { %678 = vsyncadd [#allocation12], 4294967168 }
 0x408   :  { %424 = vsyncpa [#allocation3], 1 }
 0x409   :  { %425 = vsyncpa [#allocation6], 1 }
 0x40a   :  { %426 = vsyncpa [#allocation9], 1 }
 0x40b   :  { %427 = vsyncpa [#allocation4], 1 }
 0x40c   :  { %428 = vsyncpa [#allocation12], 1 }

</bundles_post_ra>
